<compile_context>
chip_gen: v5e
topology: v5e:2x2
jax: 0.10.0
libtpu: 0.0.40
codegen_flags: <defaults>
</compile_context>

<pallas_src>
import jax
import jax.numpy as jnp
import numpy as np
from jax import lax
from jax.experimental import pallas as pl
from jax.experimental.pallas import tpu as pltpu


def _pick_batch_block(N, L):
    """Largest NB dividing N that keeps >= 2 grid steps when N >= 2 (v7x megacore)."""
    best = 1
    for nb in range(1, N + 1):
        if N % nb:
            continue
        if nb * L > 1024:              # keep per-step VMEM blocks modest
            continue
        if (N // nb) >= 2 or N == 1:
            best = nb
    return best


def _make_kernel(H, Dh, E, Sd, L, NB):
    scale = 1.0 / float(Dh) ** 0.5     # python float literal (NOT a captured jnp const)

    def kernel(x_ref, a_ref, wbig_ref, wv_ref, b_ref, a_out_ref, w_out_ref):
        # Packed weights (bf16): [ wqT | wkT | woT | wpT ] along lanes.
        wqk = wbig_ref[:, : 2 * E]                      # (E, 2E)
        wo = wbig_ref[:, 2 * E: 3 * E]                  # (E, E)
        wp = wbig_ref[:, 3 * E: 3 * E + Sd]             # (E, Sd)
        wv = wv_ref[...]                                # (Sd, E) bf16
        # Packed biases (f32): [ bq | bk | bv | bo | bp ].
        bqk = b_ref[:, : 2 * E]                         # (1, 2E)
        bv = b_ref[:, 2 * E: 3 * E]                     # (1, E)
        bo = b_ref[:, 3 * E: 4 * E]                     # (1, E)
        bp = b_ref[:, 4 * E: 4 * E + Sd]                # (1, Sd)

        # Additive causal mask built once per grid step (adds instead of per-head selects).
        row = lax.broadcasted_iota(jnp.int32, (L, L), 0)
        col = lax.broadcasted_iota(jnp.int32, (L, L), 1)
        mask_add = jnp.where(col <= row, 0.0, -1e30).astype(jnp.float32)

        for nb in range(NB):                            # static unroll over batch block
            x = x_ref[nb]                               # (L, E)  bf16 (matmul-only)
            a = a_ref[nb]                               # (L, Sd) f32 (kept for residual)

            # Fused q/k projection + v projection: bf16 MXU, f32 accumulation.
            qk = jnp.dot(x, wqk, preferred_element_type=jnp.float32) + bqk      # (L, 2E)
            v = jnp.dot(a.astype(wv.dtype), wv,
                        preferred_element_type=jnp.float32) + bv                # (L, E)
            q = qk[:, :E] * scale
            k = qk[:, E:]

            attn_acc = jnp.zeros((L, E), jnp.float32)
            for h in range(H):                          # static unroll over heads
                sl = slice(h * Dh, (h + 1) * Dh)
                qh = q[:, sl]
                kh = k[:, sl]
                vh = v[:, sl]
                s = lax.dot_general(qh, kh, (((1,), (1,)), ((), ())),
                                    preferred_element_type=jnp.float32)         # (L, L)
                s = s + mask_add
                m = jnp.max(s, axis=-1, keepdims=True)
                p = jnp.exp(s - m)
                denom = jnp.sum(p, axis=-1, keepdims=True)
                w = p * pl.reciprocal(denom, approx=True)                       # softmax
                w_out_ref[nb, h] = w
                oh = jnp.dot(w, vh, preferred_element_type=jnp.float32)         # (L, Dh)
                # Fold the per-head slice of Wo^T into the accumulator
                # (removes the lane-axis concatenate of head outputs).
                attn_acc = attn_acc + jnp.dot(
                    oh.astype(jnp.bfloat16), wo[sl, :],
                    preferred_element_type=jnp.float32)
            attn_out = attn_acc + bo                                            # (L, E)
            proj = jnp.dot(attn_out.astype(jnp.bfloat16), wp,
                           preferred_element_type=jnp.float32) + bp             # (L, Sd)
            a_out_ref[nb] = a + proj

    return kernel


def relational_cross_attention_blocks(x, a, params, num_heads):
    """x: (L, N, E) query/key ; a: (L, N, Sd) value & residual (PyTorch seq-first)."""
    L, N, E = x.shape
    Sd = a.shape[-1]
    H = num_heads
    assert E % H == 0
    Dh = E // H
    NB = _pick_batch_block(N, L)
    grid = (N // NB,)

    xb = jnp.transpose(x, (1, 0, 2)).astype(jnp.bfloat16)   # (N, L, E)  matmul-only
    ab = jnp.transpose(a, (1, 0, 2)).astype(jnp.float32)    # (N, L, Sd) residual in f32

    # Pre-transposed weights packed into two operands; biases packed into one.
    w_big = jnp.concatenate(
        [params["wq"].T, params["wk"].T, params["wo"].T, params["wp"].T],
        axis=1).astype(jnp.bfloat16)                         # (E, 3E + Sd)
    wv = params["wv"].T.astype(jnp.bfloat16)                 # (Sd, E)
    b_all = jnp.concatenate(
        [params["bq"], params["bk"], params["bv"], params["bo"], params["bp"]],
        axis=0).reshape(1, -1).astype(jnp.float32)           # (1, 4E + Sd)

    kernel = _make_kernel(H, Dh, E, Sd, L, NB)

    grid_spec = pltpu.PrefetchScalarGridSpec(
        num_scalar_prefetch=0,
        grid=grid,
        in_specs=[
            pl.BlockSpec((NB, L, E), lambda b: (b, 0, 0)),           # x (batch block)
            pl.BlockSpec((NB, L, Sd), lambda b: (b, 0, 0)),          # a (batch block)
            pl.BlockSpec((E, 3 * E + Sd), lambda b: (0, 0)),         # packed weights
            pl.BlockSpec((Sd, E), lambda b: (0, 0)),                 # wvT
            pl.BlockSpec((1, 4 * E + Sd), lambda b: (0, 0)),         # packed biases
        ],
        out_specs=[
            pl.BlockSpec((NB, L, Sd), lambda b: (b, 0, 0)),          # a_out
            pl.BlockSpec((NB, H, L, L), lambda b: (b, 0, 0, 0)),     # attn weights
        ],
    )

    a_out_b, attn_w = pl.pallas_call(
        kernel,
        grid_spec=grid_spec,
        out_shape=(
            jax.ShapeDtypeStruct((N, L, Sd), jnp.float32),
            jax.ShapeDtypeStruct((N, H, L, L), jnp.float32),
        ),
        compiler_params=pltpu.CompilerParams(dimension_semantics=("parallel",)),
    )(xb, ab, w_big, wv, b_all)

    a_out = jnp.transpose(a_out_b, (1, 0, 2))                # back to (L, N, Sd)
    return a_out, attn_w


def reference(x, a, params, num_heads):
    """Pure-JAX f32 reference (same math as torch.nn.MultiheadAttention path)."""
    L, N, E = x.shape
    Sd = a.shape[-1]
    H = num_heads
    Dh = E // H
    hp = jax.lax.Precision.HIGHEST

    q = jnp.einsum("lne,fe->lnf", x, params["wq"], precision=hp) + params["bq"]
    k = jnp.einsum("lne,fe->lnf", x, params["wk"], precision=hp) + params["bk"]
    v = jnp.einsum("lns,fs->lnf", a, params["wv"], precision=hp) + params["bv"]

    q = q.reshape(L, N, H, Dh).transpose(1, 2, 0, 3)   # (N,H,L,Dh)
    k = k.reshape(L, N, H, Dh).transpose(1, 2, 0, 3)
    v = v.reshape(L, N, H, Dh).transpose(1, 2, 0, 3)

    scores = jnp.einsum("nhld,nhmd->nhlm", q, k, precision=hp) / jnp.sqrt(
        jnp.float32(Dh))
    mask = jnp.tril(jnp.ones((L, L), dtype=bool))
    scores = jnp.where(mask, scores, -jnp.inf)
    w = jax.nn.softmax(scores, axis=-1)                # (N,H,L,L)
    o = jnp.einsum("nhlm,nhmd->nhld", w, v, precision=hp)
    o = o.transpose(2, 0, 1, 3).reshape(L, N, E)
    out = jnp.einsum("lne,fe->lnf", o, params["wo"], precision=hp) + params["bo"]
    proj = jnp.einsum("lne,se->lns", out, params["wp"], precision=hp) + params["bp"]
    return a + proj, w


if __name__ == "__main__":
    # seq L=8, batch N=2, embed_dim E=32, symbol_dim Sd=16, num_heads H=4 (head_dim 8)
    L, N, E, Sd, H = 8, 2, 32, 16, 4

    key = jax.random.PRNGKey(0)
    ks = jax.random.split(key, 12)
    params = {
        "wq": jax.random.normal(ks[0], (E, E), jnp.float32) * 0.1,
        "wk": jax.random.normal(ks[1], (E, E), jnp.float32) * 0.1,
        "wv": jax.random.normal(ks[2], (E, Sd), jnp.float32) * 0.1,
        "wo": jax.random.normal(ks[3], (E, E), jnp.float32) * 0.1,
        "wp": jax.random.normal(ks[4], (Sd, E), jnp.float32) * 0.1,
        "bq": jax.random.normal(ks[5], (E,), jnp.float32) * 0.01,
        "bk": jax.random.normal(ks[6], (E,), jnp.float32) * 0.01,
        "bv": jax.random.normal(ks[7], (E,), jnp.float32) * 0.01,
        "bo": jax.random.normal(ks[8], (E,), jnp.float32) * 0.01,
        "bp": jax.random.normal(ks[9], (Sd,), jnp.float32) * 0.01,
    }
    x = jax.random.normal(ks[10], (L, N, E), jnp.float32)    # query/key
    a = jax.random.normal(ks[11], (L, N, Sd), jnp.float32)   # value / residual

    a_out, attn_w = relational_cross_attention_blocks(x, a, params, H)
    jax.block_until_ready((a_out, attn_w))

    a_ref, w_ref = reference(x, a, params, H)
    # bf16 matmul inputs with f32 accumulation -> compare at 2e-2.
    np.testing.assert_allclose(np.asarray(a_out), np.asarray(a_ref),
                               rtol=2e-2, atol=2e-2)
    np.testing.assert_allclose(np.asarray(attn_w), np.asarray(w_ref),
                               rtol=2e-2, atol=2e-2)
    print("KERNEL_OK")
</pallas_src>

<mosaic_0001>
module attributes {stable_mosaic.version = 11 : i64} {
  func.func @kernel(%arg0: i32, %arg1: memref<1x8x32xbf16, #tpu.memory_space<vmem>>, %arg2: memref<1x8x16xf32, #tpu.memory_space<vmem>>, %arg3: memref<32x112xbf16, #tpu.memory_space<vmem>>, %arg4: memref<16x32xbf16, #tpu.memory_space<vmem>>, %arg5: memref<1x144xf32, #tpu.memory_space<vmem>>, %arg6: memref<1x8x16xf32, #tpu.memory_space<vmem>>, %arg7: memref<1x4x8x8xf32, #tpu.memory_space<vmem>>) attributes {dimension_semantics = [#tpu.dimension_semantics<parallel>], iteration_bounds = array<i64: 2>, scalar_prefetch = 0 : i64, scratch_operands = 0 : i64, tpu.core_type = #tpu.core_type<tc>, window_params = [{transform_indices = @transform_0, window_bounds = array<i64: 1, 8, 32>}, {transform_indices = @transform_1, window_bounds = array<i64: 1, 8, 16>}, {pipeline_mode = #tpu.pipeline_mode<synchronous>, transform_indices = @transform_2, window_bounds = array<i64: 32, 112>}, {pipeline_mode = #tpu.pipeline_mode<synchronous>, transform_indices = @transform_3, window_bounds = array<i64: 16, 32>}, {pipeline_mode = #tpu.pipeline_mode<synchronous>, transform_indices = @transform_4, window_bounds = array<i64: 1, 144>}, {transform_indices = @transform_5, window_bounds = array<i64: 1, 8, 16>}, {transform_indices = @transform_6, window_bounds = array<i64: 1, 4, 8, 8>}]} {
    %c0 = arith.constant 0 : index
    %c0_0 = arith.constant 0 : index
    %0 = vector.load %arg3[%c0, %c0_0] : memref<32x112xbf16, #tpu.memory_space<vmem>>, vector<32x64xbf16>
    %c0_1 = arith.constant 0 : index
    %c64 = arith.constant 64 : index
    %1 = vector.load %arg3[%c0_1, %c64] : memref<32x112xbf16, #tpu.memory_space<vmem>>, vector<32x32xbf16>
    %c0_2 = arith.constant 0 : index
    %c96 = arith.constant 96 : index
    %2 = vector.load %arg3[%c0_2, %c96] : memref<32x112xbf16, #tpu.memory_space<vmem>>, vector<32x16xbf16>
    %c0_3 = arith.constant 0 : index
    %c0_4 = arith.constant 0 : index
    %3 = vector.load %arg4[%c0_3, %c0_4] : memref<16x32xbf16, #tpu.memory_space<vmem>>, vector<16x32xbf16>
    %c0_5 = arith.constant 0 : index
    %c0_6 = arith.constant 0 : index
    %4 = vector.load %arg5[%c0_5, %c0_6] : memref<1x144xf32, #tpu.memory_space<vmem>>, vector<1x64xf32>
    %c0_7 = arith.constant 0 : index
    %c64_8 = arith.constant 64 : index
    %5 = vector.load %arg5[%c0_7, %c64_8] : memref<1x144xf32, #tpu.memory_space<vmem>>, vector<1x32xf32>
    %c0_9 = arith.constant 0 : index
    %c96_10 = arith.constant 96 : index
    %6 = vector.load %arg5[%c0_9, %c96_10] : memref<1x144xf32, #tpu.memory_space<vmem>>, vector<1x32xf32>
    %c0_11 = arith.constant 0 : index
    %c128 = arith.constant 128 : index
    %7 = vector.load %arg5[%c0_11, %c128] : memref<1x144xf32, #tpu.memory_space<vmem>>, vector<1x16xf32>
    %8 = tpu.iota {dimensions = array<i32: 0>} : vector<8x8xi32>
    %9 = tpu.iota {dimensions = array<i32: 1>} : vector<8x8xi32>
    %10 = arith.cmpi sle, %9, %8 : vector<8x8xi32>
    %cst = arith.constant 0.000000e+00 : f32
    %cst_12 = arith.constant -1.000000e+30 : f32
    %11 = vector.broadcast %cst : f32 to vector<8x8xf32>
    %12 = vector.broadcast %cst_12 : f32 to vector<8x8xf32>
    %13 = arith.select %10, %11, %12 : vector<8x8xi1>, vector<8x8xf32>
    %c0_13 = arith.constant 0 : index
    %c0_14 = arith.constant 0 : index
    %c0_15 = arith.constant 0 : index
    %14 = vector.load %arg1[%c0_13, %c0_14, %c0_15] : memref<1x8x32xbf16, #tpu.memory_space<vmem>>, vector<1x8x32xbf16>
    %15 = vector.shape_cast %14 : vector<1x8x32xbf16> to vector<8x32xbf16>
    %c0_16 = arith.constant 0 : index
    %c0_17 = arith.constant 0 : index
    %c0_18 = arith.constant 0 : index
    %16 = vector.load %arg2[%c0_16, %c0_17, %c0_18] : memref<1x8x16xf32, #tpu.memory_space<vmem>>, vector<1x8x16xf32>
    %17 = vector.shape_cast %16 : vector<1x8x16xf32> to vector<8x16xf32>
    %cst_19 = arith.constant dense<0.000000e+00> : vector<8x64xf32>
    %18 = tpu.matmul %15, %0, %cst_19 {dimension_numbers = #tpu.dot_dimension_numbers<[1], [0], [0], [1], [0, 0, 1, 1], [], []>} : vector<8x32xbf16>, vector<32x64xbf16>, vector<8x64xf32> -> vector<8x64xf32>
    %19 = vector.broadcast %4 : vector<1x64xf32> to vector<8x64xf32>
    %20 = arith.addf %18, %19 : vector<8x64xf32>
    %21 = arith.truncf %17 : vector<8x16xf32> to vector<8x16xbf16>
    %cst_20 = arith.constant dense<0.000000e+00> : vector<8x32xf32>
    %22 = tpu.matmul %21, %3, %cst_20 {dimension_numbers = #tpu.dot_dimension_numbers<[1], [0], [0], [1], [0, 0, 1, 1], [], []>} : vector<8x16xbf16>, vector<16x32xbf16>, vector<8x32xf32> -> vector<8x32xf32>
    %23 = vector.broadcast %5 : vector<1x32xf32> to vector<8x32xf32>
    %24 = arith.addf %22, %23 : vector<8x32xf32>
    %25 = vector.extract_strided_slice %20 {offsets = [0, 0], sizes = [8, 32], strides = [1, 1]} : vector<8x64xf32> to vector<8x32xf32>
    %cst_21 = arith.constant 0.353553385 : f32
    %26 = vector.broadcast %cst_21 : f32 to vector<8x32xf32>
    %27 = arith.mulf %25, %26 : vector<8x32xf32>
    %28 = vector.extract_strided_slice %20 {offsets = [0, 32], sizes = [8, 32], strides = [1, 1]} : vector<8x64xf32> to vector<8x32xf32>
    %cst_22 = arith.constant 0.000000e+00 : f32
    %29 = vector.broadcast %cst_22 : f32 to vector<8x32xf32>
    %30 = vector.extract_strided_slice %27 {offsets = [0, 0], sizes = [8, 8], strides = [1, 1]} : vector<8x32xf32> to vector<8x8xf32>
    %31 = vector.extract_strided_slice %28 {offsets = [0, 0], sizes = [8, 8], strides = [1, 1]} : vector<8x32xf32> to vector<8x8xf32>
    %32 = vector.extract_strided_slice %24 {offsets = [0, 0], sizes = [8, 8], strides = [1, 1]} : vector<8x32xf32> to vector<8x8xf32>
    %cst_23 = arith.constant dense<0.000000e+00> : vector<8x8xf32>
    %33 = tpu.matmul %30, %31, %cst_23 {dimension_numbers = #tpu.dot_dimension_numbers<[1], [1], [0], [0], [0, 0, 1, 0], [], []>} : vector<8x8xf32>, vector<8x8xf32>, vector<8x8xf32> -> vector<8x8xf32>
    %34 = arith.addf %33, %13 : vector<8x8xf32>
    %cst_24 = arith.constant dense<0xFF800000> : vector<8xf32>
    %35 = vector.multi_reduction <maximumf>, %34, %cst_24 [1] : vector<8x8xf32> to vector<8xf32>
    %36 = vector.shape_cast %35 : vector<8xf32> to vector<8x1xf32>
    %37 = vector.broadcast %36 : vector<8x1xf32> to vector<8x8xf32>
    %38 = arith.subf %34, %37 : vector<8x8xf32>
    %39 = math.exp %38 : vector<8x8xf32>
    %cst_25 = arith.constant dense<0.000000e+00> : vector<8xf32>
    %40 = vector.multi_reduction <add>, %39, %cst_25 [1] : vector<8x8xf32> to vector<8xf32>
    %41 = vector.shape_cast %40 : vector<8xf32> to vector<8x1xf32>
    %42 = tpu.reciprocal %41 {approx = true} : vector<8x1xf32> -> vector<8x1xf32>
    %43 = vector.broadcast %42 : vector<8x1xf32> to vector<8x8xf32>
    %44 = arith.mulf %39, %43 : vector<8x8xf32>
    %c0_26 = arith.constant 0 : index
    %c0_27 = arith.constant 0 : index
    %c0_28 = arith.constant 0 : index
    %c0_29 = arith.constant 0 : index
    %45 = vector.load %arg7[%c0_26, %c0_27, %c0_28, %c0_29] : memref<1x4x8x8xf32, #tpu.memory_space<vmem>>, vector<1x1x8x8xf32>
    %46 = vector.shape_cast %45 : vector<1x1x8x8xf32> to vector<8x8xf32>
    %47 = vector.shape_cast %44 : vector<8x8xf32> to vector<1x1x8x8xf32>
    tpu.vector_store %arg7[%c0_26, %c0_27, %c0_28, %c0_29], %47 {strides = array<i32>} : memref<1x4x8x8xf32, #tpu.memory_space<vmem>>, vector<1x1x8x8xf32>,
    %cst_30 = arith.constant dense<0.000000e+00> : vector<8x8xf32>
    %48 = tpu.matmul %44, %32, %cst_30 {dimension_numbers = #tpu.dot_dimension_numbers<[1], [0], [0], [1], [0, 0, 1, 1], [], []>} : vector<8x8xf32>, vector<8x8xf32>, vector<8x8xf32> -> vector<8x8xf32>
    %49 = arith.truncf %48 : vector<8x8xf32> to vector<8x8xbf16>
    %50 = vector.extract_strided_slice %1 {offsets = [0, 0], sizes = [8, 32], strides = [1, 1]} : vector<32x32xbf16> to vector<8x32xbf16>
    %cst_31 = arith.constant dense<0.000000e+00> : vector<8x32xf32>
    %51 = tpu.matmul %49, %50, %cst_31 {dimension_numbers = #tpu.dot_dimension_numbers<[1], [0], [0], [1], [0, 0, 1, 1], [], []>} : vector<8x8xbf16>, vector<8x32xbf16>, vector<8x32xf32> -> vector<8x32xf32>
    %52 = arith.addf %29, %51 : vector<8x32xf32>
    %53 = vector.extract_strided_slice %27 {offsets = [0, 8], sizes = [8, 8], strides = [1, 1]} : vector<8x32xf32> to vector<8x8xf32>
    %54 = vector.extract_strided_slice %28 {offsets = [0, 8], sizes = [8, 8], strides = [1, 1]} : vector<8x32xf32> to vector<8x8xf32>
    %55 = vector.extract_strided_slice %24 {offsets = [0, 8], sizes = [8, 8], strides = [1, 1]} : vector<8x32xf32> to vector<8x8xf32>
    %cst_32 = arith.constant dense<0.000000e+00> : vector<8x8xf32>
    %56 = tpu.matmul %53, %54, %cst_32 {dimension_numbers = #tpu.dot_dimension_numbers<[1], [1], [0], [0], [0, 0, 1, 0], [], []>} : vector<8x8xf32>, vector<8x8xf32>, vector<8x8xf32> -> vector<8x8xf32>
    %57 = arith.addf %56, %13 : vector<8x8xf32>
    %cst_33 = arith.constant dense<0xFF800000> : vector<8xf32>
    %58 = vector.multi_reduction <maximumf>, %57, %cst_33 [1] : vector<8x8xf32> to vector<8xf32>
    %59 = vector.shape_cast %58 : vector<8xf32> to vector<8x1xf32>
    %60 = vector.broadcast %59 : vector<8x1xf32> to vector<8x8xf32>
    %61 = arith.subf %57, %60 : vector<8x8xf32>
    %62 = math.exp %61 : vector<8x8xf32>
    %cst_34 = arith.constant dense<0.000000e+00> : vector<8xf32>
    %63 = vector.multi_reduction <add>, %62, %cst_34 [1] : vector<8x8xf32> to vector<8xf32>
    %64 = vector.shape_cast %63 : vector<8xf32> to vector<8x1xf32>
    %65 = tpu.reciprocal %64 {approx = true} : vector<8x1xf32> -> vector<8x1xf32>
    %66 = vector.broadcast %65 : vector<8x1xf32> to vector<8x8xf32>
    %67 = arith.mulf %62, %66 : vector<8x8xf32>
    %c0_35 = arith.constant 0 : index
    %c1 = arith.constant 1 : index
    %c0_36 = arith.constant 0 : index
    %c0_37 = arith.constant 0 : index
    %68 = vector.load %arg7[%c0_35, %c1, %c0_36, %c0_37] : memref<1x4x8x8xf32, #tpu.memory_space<vmem>>, vector<1x1x8x8xf32>
    %69 = vector.shape_cast %68 : vector<1x1x8x8xf32> to vector<8x8xf32>
    %70 = vector.shape_cast %67 : vector<8x8xf32> to vector<1x1x8x8xf32>
    tpu.vector_store %arg7[%c0_35, %c1, %c0_36, %c0_37], %70 {strides = array<i32>} : memref<1x4x8x8xf32, #tpu.memory_space<vmem>>, vector<1x1x8x8xf32>,
    %cst_38 = arith.constant dense<0.000000e+00> : vector<8x8xf32>
    %71 = tpu.matmul %67, %55, %cst_38 {dimension_numbers = #tpu.dot_dimension_numbers<[1], [0], [0], [1], [0, 0, 1, 1], [], []>} : vector<8x8xf32>, vector<8x8xf32>, vector<8x8xf32> -> vector<8x8xf32>
    %72 = arith.truncf %71 : vector<8x8xf32> to vector<8x8xbf16>
    %73 = vector.extract_strided_slice %1 {offsets = [8, 0], sizes = [8, 32], strides = [1, 1]} : vector<32x32xbf16> to vector<8x32xbf16>
    %cst_39 = arith.constant dense<0.000000e+00> : vector<8x32xf32>
    %74 = tpu.matmul %72, %73, %cst_39 {dimension_numbers = #tpu.dot_dimension_numbers<[1], [0], [0], [1], [0, 0, 1, 1], [], []>} : vector<8x8xbf16>, vector<8x32xbf16>, vector<8x32xf32> -> vector<8x32xf32>
    %75 = arith.addf %52, %74 : vector<8x32xf32>
    %76 = vector.extract_strided_slice %27 {offsets = [0, 16], sizes = [8, 8], strides = [1, 1]} : vector<8x32xf32> to vector<8x8xf32>
    %77 = vector.extract_strided_slice %28 {offsets = [0, 16], sizes = [8, 8], strides = [1, 1]} : vector<8x32xf32> to vector<8x8xf32>
    %78 = vector.extract_strided_slice %24 {offsets = [0, 16], sizes = [8, 8], strides = [1, 1]} : vector<8x32xf32> to vector<8x8xf32>
    %cst_40 = arith.constant dense<0.000000e+00> : vector<8x8xf32>
    %79 = tpu.matmul %76, %77, %cst_40 {dimension_numbers = #tpu.dot_dimension_numbers<[1], [1], [0], [0], [0, 0, 1, 0], [], []>} : vector<8x8xf32>, vector<8x8xf32>, vector<8x8xf32> -> vector<8x8xf32>
    %80 = arith.addf %79, %13 : vector<8x8xf32>
    %cst_41 = arith.constant dense<0xFF800000> : vector<8xf32>
    %81 = vector.multi_reduction <maximumf>, %80, %cst_41 [1] : vector<8x8xf32> to vector<8xf32>
    %82 = vector.shape_cast %81 : vector<8xf32> to vector<8x1xf32>
    %83 = vector.broadcast %82 : vector<8x1xf32> to vector<8x8xf32>
    %84 = arith.subf %80, %83 : vector<8x8xf32>
    %85 = math.exp %84 : vector<8x8xf32>
    %cst_42 = arith.constant dense<0.000000e+00> : vector<8xf32>
    %86 = vector.multi_reduction <add>, %85, %cst_42 [1] : vector<8x8xf32> to vector<8xf32>
    %87 = vector.shape_cast %86 : vector<8xf32> to vector<8x1xf32>
    %88 = tpu.reciprocal %87 {approx = true} : vector<8x1xf32> -> vector<8x1xf32>
    %89 = vector.broadcast %88 : vector<8x1xf32> to vector<8x8xf32>
    %90 = arith.mulf %85, %89 : vector<8x8xf32>
    %c0_43 = arith.constant 0 : index
    %c2 = arith.constant 2 : index
    %c0_44 = arith.constant 0 : index
    %c0_45 = arith.constant 0 : index
    %91 = vector.load %arg7[%c0_43, %c2, %c0_44, %c0_45] : memref<1x4x8x8xf32, #tpu.memory_space<vmem>>, vector<1x1x8x8xf32>
    %92 = vector.shape_cast %91 : vector<1x1x8x8xf32> to vector<8x8xf32>
    %93 = vector.shape_cast %90 : vector<8x8xf32> to vector<1x1x8x8xf32>
    tpu.vector_store %arg7[%c0_43, %c2, %c0_44, %c0_45], %93 {strides = array<i32>} : memref<1x4x8x8xf32, #tpu.memory_space<vmem>>, vector<1x1x8x8xf32>,
    %cst_46 = arith.constant dense<0.000000e+00> : vector<8x8xf32>
    %94 = tpu.matmul %90, %78, %cst_46 {dimension_numbers = #tpu.dot_dimension_numbers<[1], [0], [0], [1], [0, 0, 1, 1], [], []>} : vector<8x8xf32>, vector<8x8xf32>, vector<8x8xf32> -> vector<8x8xf32>
    %95 = arith.truncf %94 : vector<8x8xf32> to vector<8x8xbf16>
    %96 = vector.extract_strided_slice %1 {offsets = [16, 0], sizes = [8, 32], strides = [1, 1]} : vector<32x32xbf16> to vector<8x32xbf16>
    %cst_47 = arith.constant dense<0.000000e+00> : vector<8x32xf32>
    %97 = tpu.matmul %95, %96, %cst_47 {dimension_numbers = #tpu.dot_dimension_numbers<[1], [0], [0], [1], [0, 0, 1, 1], [], []>} : vector<8x8xbf16>, vector<8x32xbf16>, vector<8x32xf32> -> vector<8x32xf32>
    %98 = arith.addf %75, %97 : vector<8x32xf32>
    %99 = vector.extract_strided_slice %27 {offsets = [0, 24], sizes = [8, 8], strides = [1, 1]} : vector<8x32xf32> to vector<8x8xf32>
    %100 = vector.extract_strided_slice %28 {offsets = [0, 24], sizes = [8, 8], strides = [1, 1]} : vector<8x32xf32> to vector<8x8xf32>
    %101 = vector.extract_strided_slice %24 {offsets = [0, 24], sizes = [8, 8], strides = [1, 1]} : vector<8x32xf32> to vector<8x8xf32>
    %cst_48 = arith.constant dense<0.000000e+00> : vector<8x8xf32>
    %102 = tpu.matmul %99, %100, %cst_48 {dimension_numbers = #tpu.dot_dimension_numbers<[1], [1], [0], [0], [0, 0, 1, 0], [], []>} : vector<8x8xf32>, vector<8x8xf32>, vector<8x8xf32> -> vector<8x8xf32>
    %103 = arith.addf %102, %13 : vector<8x8xf32>
    %cst_49 = arith.constant dense<0xFF800000> : vector<8xf32>
    %104 = vector.multi_reduction <maximumf>, %103, %cst_49 [1] : vector<8x8xf32> to vector<8xf32>
    %105 = vector.shape_cast %104 : vector<8xf32> to vector<8x1xf32>
    %106 = vector.broadcast %105 : vector<8x1xf32> to vector<8x8xf32>
    %107 = arith.subf %103, %106 : vector<8x8xf32>
    %108 = math.exp %107 : vector<8x8xf32>
    %cst_50 = arith.constant dense<0.000000e+00> : vector<8xf32>
    %109 = vector.multi_reduction <add>, %108, %cst_50 [1] : vector<8x8xf32> to vector<8xf32>
    %110 = vector.shape_cast %109 : vector<8xf32> to vector<8x1xf32>
    %111 = tpu.reciprocal %110 {approx = true} : vector<8x1xf32> -> vector<8x1xf32>
    %112 = vector.broadcast %111 : vector<8x1xf32> to vector<8x8xf32>
    %113 = arith.mulf %108, %112 : vector<8x8xf32>
    %c0_51 = arith.constant 0 : index
    %c3 = arith.constant 3 : index
    %c0_52 = arith.constant 0 : index
    %c0_53 = arith.constant 0 : index
    %114 = vector.load %arg7[%c0_51, %c3, %c0_52, %c0_53] : memref<1x4x8x8xf32, #tpu.memory_space<vmem>>, vector<1x1x8x8xf32>
    %115 = vector.shape_cast %114 : vector<1x1x8x8xf32> to vector<8x8xf32>
    %116 = vector.shape_cast %113 : vector<8x8xf32> to vector<1x1x8x8xf32>
    tpu.vector_store %arg7[%c0_51, %c3, %c0_52, %c0_53], %116 {strides = array<i32>} : memref<1x4x8x8xf32, #tpu.memory_space<vmem>>, vector<1x1x8x8xf32>,
    %cst_54 = arith.constant dense<0.000000e+00> : vector<8x8xf32>
    %117 = tpu.matmul %113, %101, %cst_54 {dimension_numbers = #tpu.dot_dimension_numbers<[1], [0], [0], [1], [0, 0, 1, 1], [], []>} : vector<8x8xf32>, vector<8x8xf32>, vector<8x8xf32> -> vector<8x8xf32>
    %118 = arith.truncf %117 : vector<8x8xf32> to vector<8x8xbf16>
    %119 = vector.extract_strided_slice %1 {offsets = [24, 0], sizes = [8, 32], strides = [1, 1]} : vector<32x32xbf16> to vector<8x32xbf16>
    %cst_55 = arith.constant dense<0.000000e+00> : vector<8x32xf32>
    %120 = tpu.matmul %118, %119, %cst_55 {dimension_numbers = #tpu.dot_dimension_numbers<[1], [0], [0], [1], [0, 0, 1, 1], [], []>} : vector<8x8xbf16>, vector<8x32xbf16>, vector<8x32xf32> -> vector<8x32xf32>
    %121 = arith.addf %98, %120 : vector<8x32xf32>
    %122 = vector.broadcast %6 : vector<1x32xf32> to vector<8x32xf32>
    %123 = arith.addf %121, %122 : vector<8x32xf32>
    %124 = arith.truncf %123 : vector<8x32xf32> to vector<8x32xbf16>
    %cst_56 = arith.constant dense<0.000000e+00> : vector<8x16xf32>
    %125 = tpu.matmul %124, %2, %cst_56 {dimension_numbers = #tpu.dot_dimension_numbers<[1], [0], [0], [1], [0, 0, 1, 1], [], []>} : vector<8x32xbf16>, vector<32x16xbf16>, vector<8x16xf32> -> vector<8x16xf32>
    %126 = vector.broadcast %7 : vector<1x16xf32> to vector<8x16xf32>
    %127 = arith.addf %125, %126 : vector<8x16xf32>
    %128 = arith.addf %17, %127 : vector<8x16xf32>
    %c0_57 = arith.constant 0 : index
    %c0_58 = arith.constant 0 : index
    %c0_59 = arith.constant 0 : index
    %129 = vector.load %arg6[%c0_57, %c0_58, %c0_59] : memref<1x8x16xf32, #tpu.memory_space<vmem>>, vector<1x8x16xf32>
    %130 = vector.shape_cast %129 : vector<1x8x16xf32> to vector<8x16xf32>
    %131 = vector.shape_cast %128 : vector<8x16xf32> to vector<1x8x16xf32>
    tpu.vector_store %arg6[%c0_57, %c0_58, %c0_59], %131 {strides = array<i32>} : memref<1x8x16xf32, #tpu.memory_space<vmem>>, vector<1x8x16xf32>,
    return
  }
  func.func @transform_0(%arg0: i32) -> (i32, i32, i32) {
    %c0_i32 = arith.constant 0 : i32
    %c0_i32_0 = arith.constant 0 : i32
    %c0_i32_1 = arith.constant 0 : i32
    return %arg0, %c0_i32, %c0_i32_0 : i32, i32, i32
  }
  func.func @transform_1(%arg0: i32) -> (i32, i32, i32) {
    %c0_i32 = arith.constant 0 : i32
    %c0_i32_0 = arith.constant 0 : i32
    %c0_i32_1 = arith.constant 0 : i32
    return %arg0, %c0_i32, %c0_i32_0 : i32, i32, i32
  }
  func.func @transform_2(%arg0: i32) -> (i32, i32) {
    %c0_i32 = arith.constant 0 : i32
    %c0_i32_0 = arith.constant 0 : i32
    %c0_i32_1 = arith.constant 0 : i32
    return %c0_i32, %c0_i32_0 : i32, i32
  }
  func.func @transform_3(%arg0: i32) -> (i32, i32) {
    %c0_i32 = arith.constant 0 : i32
    %c0_i32_0 = arith.constant 0 : i32
    %c0_i32_1 = arith.constant 0 : i32
    return %c0_i32, %c0_i32_0 : i32, i32
  }
  func.func @transform_4(%arg0: i32) -> (i32, i32) {
    %c0_i32 = arith.constant 0 : i32
    %c0_i32_0 = arith.constant 0 : i32
    %c0_i32_1 = arith.constant 0 : i32
    return %c0_i32, %c0_i32_0 : i32, i32
  }
  func.func @transform_5(%arg0: i32) -> (i32, i32, i32) {
    %c0_i32 = arith.constant 0 : i32
    %c0_i32_0 = arith.constant 0 : i32
    %c0_i32_1 = arith.constant 0 : i32
    return %arg0, %c0_i32, %c0_i32_0 : i32, i32, i32
  }
  func.func @transform_6(%arg0: i32) -> (i32, i32, i32, i32) {
    %c0_i32 = arith.constant 0 : i32
    %c0_i32_0 = arith.constant 0 : i32
    %c0_i32_1 = arith.constant 0 : i32
    %c0_i32_2 = arith.constant 0 : i32
    return %arg0, %c0_i32, %c0_i32_0, %c0_i32_1 : i32, i32, i32, i32
  }
}

</mosaic_0001>

<bundles_post_ra>
// kernel: tpu_custom_call.1
= control target key start
LH: loop header
LB: loop body
LE: loop exit
PB: predicated region body
PF: predicated region fallthrough
CT: control target
= control target key end

     0   :  { %s1764_s0 = inlined_call_operand.hbm [shape: bf16[2,8,32], index: 0, kind: input, shape index: {}]   ;;  %s1765_s1 = inlined_call_operand.hbm [shape: f32[2,8,16], index: 1, kind: input, shape index: {}]   ;;  %s1766_s2 = inlined_call_operand.hbm [shape: bf16[32,112], index: 2, kind: input, shape index: {}]   ;;  %s1767_s3 = inlined_call_operand.hbm [shape: bf16[16,32], index: 3, kind: input, shape index: {}]   ;;  %s1768_s4 = inlined_call_operand.vmem [shape: f32[1,144], index: 4, kind: input, shape index: {}]   ;;  %s1769_s5 = inlined_call_operand.hbm [shape: f32[2,8,16], index: 5, kind: output, shape index: {0}]   ;;  %s1770_s6 = inlined_call_operand.hbm [shape: f32[2,4,8,8], index: 6, kind: output, shape index: {1}]  }
   0x1   :  { %1774 = sst [smem:[#allocation22_spill]] %s1766_s2 }
   0x2   :  { %1775 = sst [smem:[#allocation23_spill]] %s1767_s3 }
   0x3   :  { %12 = vsyncpa [#allocation3], 0 }
   0x4   :  { %14 = vsyncpa [#allocation3 + $0x1], 0 }
   0x5   :  { %15 = vsyncpa [#allocation6], 0 }
   0x6   :  { %17 = vsyncpa [#allocation6 + $0x1], 0 }
   0x7   :  { %18 = vsyncpa [#allocation9], 0 }
   0x8   :  { %19 = vsyncpa [#allocation4], 0 }
   0x9   :  { %21 = vsyncpa [#allocation4 + $0x1], 0 }
   0xa   :  { %22 = vsyncpa [#allocation12], 0 }
   0xb   :  { %24 = vsyncpa [#allocation12 + $0x1], 0  ;;  %s1457_s21 = smov 0   ;;  %s1459_s22 = smov 0  }
   0xc   :  { %s1461_s23 = smov 0   ;;  %s1463_s24 = smov 0  }
   0xd LB: > { %1776 = sst [smem:[#allocation19_spill]] %s1400_s23  ;;  %s1481_s28 = sadd.s32 4294967295, %s1404_s24   ;;  %s1404_s24 = sphi %s1463_s24, %s1788_s24   ;;  %s1400_s23 = sphi %s1461_s23, %s1790_s23   ;;  %s1396_s22 = sphi %s1459_s22, %s1792_s22   ;;  %s1392_s21 = sphi %s1457_s21, %s1791_s21  }
   0xe   : > { %s1777_s2 = sld [smem:[#allocation22_spill]]  ;;  %p1006_p0 = scmp.ge.s32.totalorder %s1404_s24, 1 }
   0xf   : > { %p51_p1 = scmp.eq.s32.totalorder %s1481_s28, 0  ;;  %p202_p2 = scmp.lt.s32.totalorder %s1404_s24, 3 }
  0x10   : > { %s1406_s30 = smov [#allocation7]   ;;  %s1779_s3 = sld [smem:[#allocation23_spill]] }
  0x11   : > { %p1486_p3 = pnand %p1006_p0, %p202_p2  ;;  %s215_s7 = sshll.u32 %s1406_s30, 4  ;;  %s216_s7 = int_to_ptr.vmem [resolvable:$true] %s215_s7 }
  0x12   : > { %s1407_s11 = smov [#allocation8]   ;;  %s1408_s13 = smov 64  }
  0x13   : > { %p1081_p4 = pneg %p1486_p3  ;;  %s229_s12 = sshll.u32 %s1407_s11, 4  ;;  %s230_s12 = int_to_ptr.vmem [resolvable:$true] %s229_s12 }
  0x14   : > { %s213_s27 = sshll.u32 %s1777_s2, 4  ;;  %s1409_s14 = smov 4   ;;  %s214_s27 = int_to_ptr.hbm [resolvable:$true] %s213_s27 }
  0x15   : > { %p1082_p6 = pnand %p1081_p4, %p51_p1  ;;  %s1005_s15 = sadd.s32 4294967294, %s1404_s24  }
  0x16   : > { %s227_s10 = sshll.u32 %s1779_s3, 4  ;;  %s1500_s16 = sadd.s32 1, %s1404_s24   ;;  %s228_s10 = int_to_ptr.hbm [resolvable:$true] %s227_s10 }
  0x17   : > { %1084 = dma.hbm_to_vmem [thread:$0]  (!%p1082_p6), %s214_s27, 256, %s216_s7, [#allocation6], %s1408_s13, %s1408_s13, %s1409_s14  }
  0x18   : > { %1087 = dma.hbm_to_vmem [thread:$0]  (!%p1082_p6), %s228_s10, 128, %s230_s12, [#allocation9], %s1408_s13, %s1408_s13, %s1409_s14  }
  0x19   : > { %1780 = sst [smem:[#allocation20_spill]] %s1500_s16  ;;  %s34_s17 = ssub.s32 %s1404_s24, %s1500_s16 }
  0x1a   : > { %s37_s18 = sadd.s32 1, %s1400_s23  ;;  %p35_p7 = scmp.eq.s32.totalorder %s34_s17, 0 }
  0x1b   : > { %p44_p8 = scmp.ne.s32.totalorder %s1400_s23, %s1396_s22  ;;  %p45_p9 = scmp.eq.s32.totalorder %s1404_s24, 0 }
  0x1c   : > { %p50_p10 = scmp.ne.s32.totalorder %s1396_s22, %s1392_s21  ;;  %p163_p13 = scmp.eq.s32.totalorder %s1481_s28, 1 }
  0x1d   : > { %s1511_s19 = scalar_select %p35_p7, %s1400_s23, %s37_s18  }
  0x1e   : > { %p1513_p11 = por %p45_p9, %p44_p8  ;;  %p1519_p12 = por %p51_p1, %p50_p10 }
  0x1f   : > { %1781 = sst [smem:[#allocation21_spill]] %s1511_s19  ;;  %p169_p0 = scmp.eq.s32.totalorder %s1005_s15, 1 }
  0x20   : > { %p1104_p2 = scmp.lt.s32.totalorder %s1404_s24, 2  ;;  %s1526_s26 = sand.u32 1, %s1400_s23  }
  0x21   : > { %p1528_p4 = por %p163_p13, %p44_p8  ;;  %p1532_p6 = por %p169_p0, %p50_p10 }
  0x22   : > { %s1010_s7 = sshll.u32 %s1526_s26, 2  ;;  %s1011_s8 = sshll.u32 %s1404_s24, 2 }
  0x23   : > { %s254_s11 = scalar_lea.hbm %s1764_s0, %s1011_s8  ;;  %s250_s12 = scalar_lea.vmem [#allocation2], %s1010_s7 }
  0x24   : > { %s258_s13 = sshll.u32 %s250_s12, 4  ;;  %s256_s14 = sshll.u32 %s254_s11, 4  ;;  %s259_s13 = int_to_ptr.vmem [resolvable:$true] %s258_s13  ;;  %s257_s14 = int_to_ptr.hbm [resolvable:$true] %s256_s14 }
  0x25   : > { %p1543_p7 = pnand %p1104_p2, %p1513_p11  ;;  %s265_s17 = sand.u32 1, %s1404_s24  }
  0x26   : > { %s1012_s18 = sshll.u32 %s1526_s26, 3  ;;  %s247_s2 = scalar_lea.sflag [#allocation3], %s1526_s26 }
  0x27   : > { %s1234_s3 = sshra.s32 %s257_s14, 4  ;;  %p1238_p9 = pneg %p1543_p7  ;;  %s1235_s3 = int_to_ptr.hbm [resolvable:$true] %s1234_s3 }
  0x28   : > { %s1236_s19 = scalar_lea.hbm %s1235_s3, 4  ;;  %s1241_s8 = scalar_lea.hbm %s1764_s0, 8 }
  0x29   : > { %p1237_p8 = scmp.ne.s32.totalorder %s1235_s3, %s1236_s19  ;;  %p1242_p11 = scmp.lt.s32.totalorder %s1235_s3, %s1764_s0 }
  0x2a   : > { %p1243_p0 = scmp.lt.s32.totalorder %s1241_s8, %s1236_s19 }
  0x2b   : > { %p1239_p10 = pnand %p1238_p9, %p1237_p8 }
  0x2c   : > { %p1244_p2 = por %p1243_p0, %p1242_p11 }
  0x2d   : > { %p1240_p13 = pneg %p1239_p10 }
  0x2f   : > { %p1245_p5 = pnand %p1244_p2, %p1240_p13 }
  0x31   : > { %1248 = shalt.err (!%p1245_p5)
}
  0x32   : > { %1091 = dma.hbm_to_vmem [thread:$0]  (!%p1543_p7), %s257_s14, 64, %s259_s13, %s247_s2  }
  0x33   : > { %s1013_s26 = sshll.u32 %s1404_s24, 3  ;;  %s269_s20 = scalar_lea.vmem [#allocation5], %s1012_s18 }
  0x34   : > { %s273_s23 = scalar_lea.hbm %s1765_s1, %s1013_s26  ;;  %s277_s7 = sshll.u32 %s269_s20, 4  ;;  %s278_s7 = int_to_ptr.vmem [resolvable:$true] %s277_s7 }
  0x35   : > { %s275_s16 = sshll.u32 %s273_s23, 4  ;;  %s266_s3 = scalar_lea.sflag [#allocation6], %s265_s17  ;;  %s276_s16 = int_to_ptr.hbm [resolvable:$true] %s275_s16 }
  0x36   : > { %s1264_s19 = sshra.s32 %s276_s16, 4  ;;  %s1271_s14 = scalar_lea.hbm %s1765_s1, 16  ;;  %s1265_s19 = int_to_ptr.hbm [resolvable:$true] %s1264_s19 }
  0x37   : > { %s1266_s8 = scalar_lea.hbm %s1265_s19, 8  ;;  %p1272_p13 = scmp.lt.s32.totalorder %s1265_s19, %s1765_s1 }
  0x38   : > { %p1267_p5 = scmp.ne.s32.totalorder %s1265_s19, %s1266_s8  ;;  %p1273_p11 = scmp.lt.s32.totalorder %s1271_s14, %s1266_s8 }
  0x3a   : > { %p1269_p8 = pnand %p1267_p5, %p1238_p9  ;;  %p1274_p0 = por %p1273_p11, %p1272_p13 }
  0x3c   : > { %p1270_p10 = pneg %p1269_p8 }
  0x3e   : > { %p1275_p2 = pnand %p1274_p0, %p1270_p10 }
  0x40   : > { %1278 = shalt.err (!%p1275_p2)
}
  0x41   : > { %1094 = dma.hbm_to_vmem [thread:$0]  (!%p1543_p7), %s276_s16, 128, %s278_s7, %s266_s3  }
  0x42   : > { %286 = sbr.rel (%p1486_p3) target bundleno = 1939 (0x793), region = 40  ;;  %s1581_s23 = sand.u32 (!%p1486_p3), 1, %s1396_s22  }
  0x43   : > { %s1015_s17 = sshll.u32 (!%p1486_p3), %s1581_s23, 2  ;;  %s289_s18 = scalar_lea.sflag (!%p1486_p3), [#allocation3], %s1581_s23 }
  0x44   : > { %s292_s26 = scalar_lea.vmem (!%p1486_p3), [#allocation2], %s1015_s17 }
  0x47   : > { %1367 = dma.done.wait (%p1519_p12), %s289_s18, 64  }
  0x48   : > { %1369 = vsyncadd (%p1519_p12), %s289_s18, 4294967232  ;;  %s298_s29 = sand.u32 1, %s1481_s28   ;;  %s1016_s16 = sshll.u32 %s1581_s23, 3 }
  0x49   : > { %s299_s15 = scalar_lea.sflag [#allocation6], %s298_s29  ;;  %s1593_s11 = scalar_lea.vmem [#allocation5], %s1016_s16 }
  0x4a   : > { %1371 = dma.done.wait (%p1519_p12), %s299_s15, 128  }
  0x4b   : > { %1373 = vsyncadd (%p1519_p12), %s299_s15, 4294967168 }
  0x4c   : > { %1375 = dma.done.wait (%p51_p1), [#allocation6], 256  }
  0x4d   : > { %1377 = vsyncadd (%p51_p1), [#allocation6], 4294967040 }
  0x4e   : > { %1379 = dma.done.wait (%p51_p1), [#allocation9], 128  }
  0x4f   : > { %1381 = vsyncadd (%p51_p1), [#allocation9], 4294967168  ;;  %v1607_v0 = vld [vmem:[#allocation7 + $0x8] sm:$0xff]   ;;  %v1610_v1 = vld [vmem:[#allocation7] sm:$0xff]   ;;  %vm384_vm0 = vcmask 261120   ;;  %s1410_s20 = smov 88   ;;  %v361_v9 = vlaneseq }
  0x50   : > { %394 = vmatpush.bf16.msra.mxu0 %v1607_v0  ;;  %v367_v2 = vld [vmem:[%s292_s26] sm:$0xf]  ;;  %s1411_s7 = smov 96   ;;  %s1412_s3 = smov 120   ;;  %vm432_vm1 = vcmask 64512   ;;  %v1054_v17 = vld [vmem:[#allocation8] sm:$0xff]  ;;  %v1059_v45 = vunpack.c.h.b16 %v1610_v1  ;;  %v1058_v63 = vunpack.c.l.b16 %v1610_v1 }
  0x51   : > { %v1617_v3 = vld [vmem:[%s1768_s4] ss:$0 sm:$0xff]  ;;  %v362_v10 = vshrl.u32 %v361_v9, 7  ;;  %v364_v11 = vand.u32 127, %v361_v9  ;;  %v1413_v12 = vmov -1e+30   ;;  %422 = vmatpush.bf16.msra.mxu1 %v1054_v17 }
  0x52   : > { %v1633_v18 = vld [vmem:[%s1593_s11] sm:$0xff]  ;;  %vm411_vm3 = vcmask 130048   ;;  %s1414_s19 = smov 64   ;;  %s1020_s8 = sshll.u32 %s1581_s23, 5  ;;  %v563_v46 = vpack.c.b16 %v1059_v45, %v1059_v45  ;;  %vm569_vm4 = vcmask 1043456  }
  0x53   : > { %vm365_vm2 = vcmp.le.s32.totalorder %v364_v11, %v362_v10  ;;  %v401_v19 = vpack.c.bf16 %v1633_v18, %v1633_v18  ;;  %s1642_s2 = scalar_lea.vmem [#allocation11], %s1020_s8  ;;  %s1415_s13 = smov 112  }
  0x54   : > { %395 = vmatpush.bf16.msra.mxu0 %v1610_v1  ;;  %v1628_v13 = vsel %vm365_vm2, 0.0, %v1413_v12  ;;  %s1416_s14 = smov 104   ;;  %s1417_s9 = smov 80  }
  0x55   : > { %1026 = vmatmul.msk.bf16.vlgmr.msra.gmra.mxu1 %vm411_vm3, %v401_v19  ;;  %s1418_s10 = smov 72   ;;  %s1419_s17 = smov 32  }
  0x56   : > { %s854_s18 = sshll.u32 %s1642_s2, 4  ;;  %s1055_s26 = sshll.u32 %s1481_s28, 5  ;;  %s855_s18 = int_to_ptr.vmem [resolvable:$true] %s854_s18 }
  0x57   : > { %1021 = vmatmul.msk.bf16.vlgmr.msra.gmra.mxu0 %vm384_vm0, %v367_v2  ;;  %v586_v2 = vpack.c.b16 %v1058_v63, %v1058_v63  ;;  %s853_s11 = scalar_lea.hbm %s1770_s6, %s1055_s26  ;;  %s828_s12 = scalar_lea.sflag [#allocation12], %s1581_s23 }
  0x58   : > { %s856_s25 = sshll.u32 %s853_s11, 4  ;;  %s1314_s8 = scalar_lea.hbm %s1770_s6, 64  ;;  %s857_s25 = int_to_ptr.hbm [resolvable:$true] %s856_s25 }
  0xd2   : > { %v424_v25 = vpop.f32.mrf.mxu1 }
  0xd4   : > { %v397_v4 = vpop.f32.mrf.mxu0 }
  0xd5   : > { %v1620_v5 = vadd.f32 %v1617_v3, %v397_v4 }
  0xd7   : > { %496 = vrot.lane.b32.xlu2 %v1620_v5, %s1410_s20  ;;  %430 = vrot.lane.b32.xlu0 %v1620_v5, %s1411_s7  ;;  %v428_v7 = vmul.f32 0.35355338, %v1620_v5  ;;  %s1308_s20 = sshra.s32 %s857_s25, 4  ;;  %s1309_s20 = int_to_ptr.hbm [resolvable:$true] %s1308_s20 }
  0xd8   : > { %s1310_s7 = scalar_lea.hbm %s1309_s20, 32  ;;  %p1315_p7 = scmp.lt.s32.totalorder %s1309_s20, %s1770_s6 }
  0xd9   : > { %p1311_p1 = scmp.ne.s32.totalorder %s1309_s20, %s1310_s7  ;;  %p1316_p9 = scmp.lt.s32.totalorder %s1314_s8, %s1310_s7 }
  0xda   : > { %v426_v26 = vpop.f32.mrf.mxu1 }
  0xdb   : > { %p1312_p3 = pnand %p1311_p1, %p1528_p4  ;;  %p1317_p5 = por %p1316_p9, %p1315_p7 }
  0xdc   : > { %v399_v6 = vpop.f32.mrf.mxu0 }
  0xdd   : > { %p1313_p12 = pneg %p1312_p3 }
  0xdf   : > { %494 = vrot.lane.b32.xlu2 %v428_v7, %s1412_s3  ;;  %p1318_p8 = pnand %p1317_p5, %p1313_p12 }
 0x131   : > { %v497_v31 = vpop.permute.xlu2 %496 }
 0x139   : > { %v495_v33 = vpop.permute.xlu2 %494 }
 0x149   : > { %v431_v8 = vpop.permute.xlu0 %430 }
 0x14a   : > { %1027 = vmatpush.xpose.msk.msra.mxu2 %vm432_vm1, %v431_v8 }
 0x14d   : > { %1028 = vmatmul.msk.f32.vlgmr.msra.gmra.mxu2 %vm432_vm1, %v428_v7 }
 0x1d0   : > { %v455_v14 = vpop.f32.mrf.mxu2 }
 0x1d1   : > { %v456_v15 = vadd.f32 %v455_v14, %v1628_v13 }
 0x1d3   : > { %v458_v16 = vsel %vm432_vm1, %v456_v15, -inf }
 0x1d4   : > { %459 = vmax.xlane.f32.xlu0 %v458_v16 }
 0x247   : > { %v460_v20 = vpop.xlane.xlu0 %459 }
 0x248   : > { %v461_v21 = vsub.f32 %v456_v15, %v460_v20 }
 0x24a   : > { %v462_v22 = vmul.f32 1.442695, %v461_v21  ;;  %v1062_v21 = vunpack.c.l.b16 %v1607_v0 }
 0x24c   : > { %1158 = vpow2.f32 %v462_v22  ;;  %v676_v22 = vpack.c.b16 %v1062_v21, %v1062_v21 }
 0x252   : > { %v1159_v23 = vpop.eup %1158 }
 0x253   : > { %v464_v24 = vsel %vm432_vm1, %v1159_v23, 0.0 }
 0x254   : > { %465 = vadd.xlane.f32.xlu1 %v464_v24 }
 0x26d   : > { %408 = vrot.lane.b32.xlu1 %v1617_v3, %s1414_s19 }
 0x2c7   : > { %v466_v27 = vpop.xlane.xlu1 %465 }
 0x2c8   : > { %1160 = vrcp.f32 %v466_v27  ;;  %v1063_v27 = vunpack.c.h.b16 %v1607_v0 }
 0x2ce   : > { %v1161_v28 = vpop.eup %1160 }
 0x2cf   : > { %v468_v29 = vmul.f32 %v1161_v28, %v1159_v23 }
 0x2d1   : > { %469 = vst.msk [vmem:[%s1642_s2] sm:$0xff] %vm432_vm1, %v468_v29 }
 0x2df   : > { %v409_v30 = vpop.permute.xlu1 %408 }
 0x2e0   : > { %v1646_v32 = vadd.f32 %v424_v25, %v409_v30 }
 0x2e2   : > { %536 = vrot.lane.b32.xlu0 %v1646_v32, %s1412_s3  ;;  %488 = vmatpush.msra.mxu3 %v1646_v32 }
 0x2e3   : > { %1029 = vmatmul.msk.f32.vlgmr.msra.gmra.mxu3 %vm432_vm1, %v468_v29  ;;  %v767_v29 = vpack.c.b16 %v1063_v27, %v1063_v27 }
 0x2e4   : > { %1030 = vmatpush.xpose.msk.msrb.mxu3 %vm432_vm1, %v497_v31 }
 0x2ea   : > { %608 = vrot.lane.b32.xlu0 %v428_v7, %s1415_s13 }
 0x2eb   : > { %1031 = vmatmul.msk.f32.vlgmr.msrb.gmra.mxu3 %vm432_vm1, %v495_v33 }
 0x2f2   : > { %699 = vrot.lane.b32.xlu0 %v428_v7, %s1416_s14 }
 0x354   : > { %v537_v34 = vpop.permute.xlu0 %536 }
 0x355   : > { %557 = vmatpush.msrb.mxu2 %v537_v34 }
 0x35c   : > { %v609_v50 = vpop.permute.xlu0 %608 }
 0x364   : > { %v700_v52 = vpop.permute.xlu0 %699 }
 0x366   : > { %v1656_v35 = vpop.f32.mrf.mxu3 }
 0x367   : > { %v493_v20 = vpack.c.bf16 %v1656_v35, %v1656_v35 }
 0x36e   : > { %v519_v36 = vpop.f32.mrf.mxu3 }
 0x36f   : > { %v520_v37 = vadd.f32 %v519_v36, %v1628_v13 }
 0x371   : > { %v522_v38 = vsel %vm432_vm1, %v520_v37, -inf }
 0x372   : > { %523 = vmax.xlane.f32.xlu2 %v522_v38 }
 0x38a   : > { %610 = vrot.lane.b32.xlu2 %v1620_v5, %s1417_s9 }
 0x3e5   : > { %v524_v39 = vpop.xlane.xlu2 %523 }
 0x3e6   : > { %v525_v40 = vsub.f32 %v520_v37, %v524_v39 }
 0x3e8   : > { %v526_v41 = vmul.f32 1.442695, %v525_v40 }
 0x3ea   : > { %1162 = vpow2.f32 %v526_v41 }
 0x3ed   : > { %v611_v42 = vpop.permute.xlu2 %610 }
 0x3ee   : > { %1036 = vmatpush.xpose.msk.msra.mxu2 %vm432_vm1, %v611_v42 }
 0x3f0   : > { %v1163_v43 = vpop.eup %1162 }
 0x3f1   : > { %v528_v44 = vsel %vm432_vm1, %v1163_v43, 0.0 }
 0x3f2   : > { %529 = vadd.xlane.f32.xlu1 %v528_v44 }
 0x40b   : > { %701 = vrot.lane.b32.xlu1 %v1620_v5, %s1418_s10 }
 0x413   : > { %564 = vrot.lane.b32.xlu1 %v563_v46, %s1414_s19 }
 0x465   : > { %v530_v47 = vpop.xlane.xlu1 %529 }
 0x466   : > { %1164 = vrcp.f32 %v530_v47 }
 0x46c   : > { %v1165_v48 = vpop.eup %1164 }
 0x46d   : > { %v532_v49 = vmul.f32 %v1165_v48, %v1163_v43 }
 0x46f   : > { %1032 = vst.msk [vmem:[%s1642_s2 + $0x8] sm:$0xff] %vm432_vm1, %v532_v49  ;;  %1033 = vmatmul.msk.f32.vlgmr.msrb.gmra.mxu2 %vm432_vm1, %v532_v49 }
 0x477   : > { %1037 = vmatmul.msk.f32.vlgmr.msra.gmra.mxu2 %vm432_vm1, %v609_v50 }
 0x47d   : > { %v702_v51 = vpop.permute.xlu1 %701 }
 0x47e   : > { %1041 = vmatpush.xpose.msk.msrb.mxu0 %vm432_vm1, %v702_v51 }
 0x481   : > { %1042 = vmatmul.msk.f32.vlgmr.msrb.gmra.mxu0 %vm432_vm1, %v700_v52 }
 0x485   : > { %v565_v53 = vpop.permute.xlu1 %564 }
 0x486   : > { %v571_v54 = vsel %vm569_vm4, %v565_v53, 0 }
 0x487   : > { %580 = vmatpush.bf16.msra.mxu3 %v571_v54 }
 0x4f2   : > { %v559_v55 = vpop.f32.mrf.mxu2 }
 0x4f3   : > { %v562_v56 = vpack.c.bf16 %v559_v55, %v559_v55 }
 0x4f5   : > { %1034 = vmatmul.msk.bf16.vlgmr.msra.gmra.mxu3 %vm432_vm1, %v562_v56 }
 0x4fa   : > { %v633_v57 = vpop.f32.mrf.mxu2 }
 0x4fb   : > { %v634_v58 = vadd.f32 %v633_v57, %v1628_v13 }
 0x4fd   : > { %v636_v59 = vsel %vm432_vm1, %v634_v58, -inf }
 0x4fe   : > { %v724_v60 = vpop.f32.mrf.mxu0  ;;  %637 = vmax.xlane.f32.xlu2 %v636_v59 }
 0x4ff   : > { %v725_v61 = vadd.f32 %v724_v60, %v1628_v13 }
 0x501   : > { %v727_v62 = vsel %vm432_vm1, %v725_v61, -inf }
 0x502   : > { %728 = vmax.xlane.f32.xlu0 %v727_v62 }
 0x516   : > { %649 = vrot.lane.b32.xlu0 %v1646_v32, %s1415_s13 }
 0x51e   : > { %587 = vrot.lane.b32.xlu0 %v586_v2, %s1414_s19 }
 0x526   : > { %800 = vrot.lane.b32.xlu0 %v1607_v0, %s1419_s17 }
 0x52e   : > { %798 = vrot.lane.b32.xlu0 %v1610_v1, %s1419_s17 }
 0x571   : > { %v638_v4 = vpop.xlane.xlu2 %637 }
 0x572   : > { %v639_v5 = vsub.f32 %v634_v58, %v638_v4 }
 0x574   : > { %v640_v6 = vmul.f32 1.442695, %v639_v5 }
 0x575   : > { %v729_v7 = vpop.xlane.xlu0 %728 }
 0x576   : > { %1166 = vpow2.f32 %v640_v6  ;;  %v730_v8 = vsub.f32 %v725_v61, %v729_v7 }
 0x578   : > { %v731_v9 = vmul.f32 1.442695, %v730_v8  ;;  %v582_v10 = vpop.f32.mrf.mxu3 }
 0x57a   : > { %1168 = vpow2.f32 %v731_v9 }
 0x57c   : > { %v1167_v11 = vpop.eup %1166 }
 0x57d   : > { %v642_v12 = vsel %vm432_vm1, %v1167_v11, 0.0 }
 0x57e   : > { %643 = vadd.xlane.f32.xlu1 %v642_v12 }
 0x580   : > { %v1169_v13 = vpop.eup %1168  ;;  %v584_v14 = vpop.f32.mrf.mxu3 }
 0x581   : > { %v733_v15 = vsel %vm432_vm1, %v1169_v13, 0.0 }
 0x582   : > { %734 = vadd.xlane.f32.xlu2 %v733_v15 }
 0x588   : > { %v650_v16 = vpop.permute.xlu0 %649 }
 0x589   : > { %670 = vmatpush.msrb.mxu3 %v650_v16 }
 0x590   : > { %v588_v17 = vpop.permute.xlu0 %587 }
 0x591   : > { %v593_v19 = vsel %vm569_vm4, %v588_v17, 0 }
 0x592   : > { %602 = vmatpush.bf16.msrb.mxu1 %v593_v19 }
 0x595   : > { %1035 = vmatmul.msk.bf16.vlgmr.msrb.gmra.mxu1 %vm432_vm1, %v493_v20 }
 0x597   : > { %677 = vrot.lane.b32.xlu1 %v676_v22, %s1414_s19 }
 0x598   : > { %v801_v38 = vpop.permute.xlu0 %800 }
 0x599   : > { %813 = vmatpush.bf16.msra.mxu0 %v801_v38 }
 0x59a   : > { %740 = vrot.lane.b32.xlu2 %v1646_v32, %s1416_s14 }
 0x5a0   : > { %v799_v1 = vpop.permute.xlu0 %798 }
 0x5a1   : > { %814 = vmatpush.bf16.msra.mxu0 %v799_v1 }
 0x5a2   : > { %768 = vrot.lane.b32.xlu2 %v767_v29, %s1414_s19 }
 0x5aa   : > { %790 = vrot.lane.b32.xlu2 %v1617_v3, %s1419_s17 }
 0x5f1   : > { %v644_v23 = vpop.xlane.xlu1 %643 }
 0x5f2   : > { %1170 = vrcp.f32 %v644_v23 }
 0x5f5   : > { %v735_v24 = vpop.xlane.xlu2 %734 }
 0x5f6   : > { %1172 = vrcp.f32 %v735_v24 }
 0x5f8   : > { %v1171_v25 = vpop.eup %1170 }
 0x5f9   : > { %v646_v26 = vmul.f32 %v1171_v25, %v1167_v11 }
 0x5fb   : > { %1038 = vst.msk [vmem:[%s1642_s2 + $0x10] sm:$0xff] %vm432_vm1, %v646_v26  ;;  %1039 = vmatmul.msk.f32.vlgmr.msrb.gmra.mxu3 %vm432_vm1, %v646_v26 }
 0x5fc   : > { %v1173_v28 = vpop.eup %1172 }
 0x5fd   : > { %v737_v30 = vmul.f32 %v1173_v28, %v1169_v13  ;;  %v741_v31 = vpop.permute.xlu2 %740 }
 0x5fe   : > { %761 = vmatpush.msra.mxu3 %v741_v31 }
 0x5ff   : > { %1043 = vst.msk [vmem:[%s1642_s2 + $0x18] sm:$0xff] %vm432_vm1, %v737_v30 }
 0x603   : > { %1044 = vmatmul.msk.f32.vlgmr.msra.gmra.mxu3 %vm432_vm1, %v737_v30 }
 0x605   : > { %v769_v36 = vpop.permute.xlu2 %768 }
 0x606   : > { %v774_v37 = vsel %vm569_vm4, %v769_v36, 0 }
 0x607   : > { %783 = vmatpush.bf16.msra.mxu1 %v774_v37 }
 0x609   : > { %v678_v34 = vpop.permute.xlu1 %677 }
 0x60a   : > { %v683_v35 = vsel %vm569_vm4, %v678_v34, 0 }
 0x60b   : > { %692 = vmatpush.bf16.msrb.mxu2 %v683_v35 }
 0x60d   : > { %v791_v45 = vpop.permute.xlu2 %790 }
 0x612   : > { %v604_v32 = vpop.f32.mrf.mxu1 }
 0x613   : > { %v605_v41 = vadd.f32 %v604_v32, %v582_v10 }
 0x61a   : > { %v606_v33 = vpop.f32.mrf.mxu1 }
 0x67e   : > { %v672_v39 = vpop.f32.mrf.mxu3 }
 0x67f   : > { %v675_v40 = vpack.c.bf16 %v672_v39, %v672_v39 }
 0x681   : > { %1040 = vmatmul.msk.bf16.vlgmr.msrb.gmra.mxu2 %vm432_vm1, %v675_v40 }
 0x686   : > { %v763_v0 = vpop.f32.mrf.mxu3 }
 0x687   : > { %v766_v3 = vpack.c.bf16 %v763_v0, %v763_v0 }
 0x689   : > { %1045 = vmatmul.msk.bf16.vlgmr.msra.gmra.mxu1 %vm432_vm1, %v766_v3 }
 0x704   : > { %v694_v42 = vpop.f32.mrf.mxu2 }
 0x705   : > { %v698_v43 = vadd.f32 %v694_v42, %v605_v41 }
 0x706   : > { %v785_v44 = vpop.f32.mrf.mxu1 }
 0x707   : > { %v789_v46 = vadd.f32 %v785_v44, %v698_v43 }
 0x709   : > { %v793_v47 = vadd.f32 %v791_v45, %v789_v46 }
 0x70b   : > { %v794_v48 = vpack.c.bf16 %v793_v47, %v793_v47 }
 0x70c   : > { %v696_v49 = vpop.f32.mrf.mxu2 }
 0x70d   : > { %1046 = vmatmul.msk.bf16.vlgmr.msra.gmra.mxu0 %vm384_vm0, %v794_v48 }
 0x70e   : > { %v787_v50 = vpop.f32.mrf.mxu1 }
 0x70f   : > { %1321 = shalt.err (!%p1318_p8)
}
 0x710   : > { %s1420_s14 = smov 128   ;;  %s1421_s9 = smov 8   ;;  %v1157_v51 = vld [vmem:[%s1768_s4 + $0x1] ss:$0 sm:$0xff] }
 0x711   : > { %1078 = dma.vmem_to_hbm [thread:$0]  (%p1528_p4), %s855_s18, 512, %s857_s25, %s828_s12, %s1420_s14, %s1420_s14, %s1421_s9  }
 0x712   : > { %s1049_s10 = sshll.u32 %s1481_s28, 3  ;;  %s344_s20 = scalar_lea.vmem [#allocation10], %s1016_s16 }
 0x713   : > { %s838_s11 = scalar_lea.hbm %s1769_s5, %s1049_s10  ;;  %s840_s7 = sshll.u32 %s344_s20, 4  ;;  %s841_s7 = int_to_ptr.vmem [resolvable:$true] %s840_s7 }
 0x714   : > { %s842_s3 = sshll.u32 %s838_s11, 4  ;;  %s823_s28 = scalar_lea.sflag [#allocation4], %s1581_s23  ;;  %s843_s3 = int_to_ptr.hbm [resolvable:$true] %s842_s3 }
 0x715   : > { %s1336_s18 = sshra.s32 %s843_s3, 4  ;;  %s1342_s16 = scalar_lea.hbm %s1769_s5, 16  ;;  %s1337_s18 = int_to_ptr.hbm [resolvable:$true] %s1336_s18 }
 0x716   : > { %s1338_s25 = scalar_lea.hbm %s1337_s18, 8  ;;  %p1343_p0 = scmp.lt.s32.totalorder %s1337_s18, %s1769_s5 }
 0x717   : > { %p1339_p10 = scmp.ne.s32.totalorder %s1337_s18, %s1338_s25  ;;  %p1344_p2 = scmp.lt.s32.totalorder %s1342_s16, %s1338_s25 }
 0x719   : > { %p1340_p13 = pnand %p1339_p10, %p1528_p4  ;;  %p1345_p1 = por %p1344_p2, %p1343_p0 }
 0x71b   : > { %p1341_p11 = pneg %p1340_p13 }
 0x71d   : > { %p1346_p3 = pnand %p1345_p1, %p1341_p11 }
 0x78a   : > { %v816_v52 = vpop.f32.mrf.mxu0 }
 0x78b   : > { %v817_v53 = vadd.f32 %v1157_v51, %v816_v52 }
 0x78d   : > { %v820_v54 = vadd.f32 %v817_v53, %v1633_v18 }
 0x78f   : > { %821 = vst.msk [vmem:[%s344_s20] sm:$0xff] %vm411_vm3, %v820_v54 }
 0x790   : > { %1349 = shalt.err (!%p1346_p3)
}
 0x791   : > { %1077 = dma.vmem_to_hbm [thread:$0]  (%p1528_p4), %s841_s7, 128, %s843_s3, %s823_s28  }
 0x792   : > { %v818_v18 = vpop.f32.mrf.mxu0 }
 0x793 PF: > { %s871_s23 = sand.u32 1, %s1392_s21   ;;  %p1787_p12 = scmp.ge.s32.totalorder %s1404_s24, 2 }
 0x794   : > { %s872_s13 = scalar_lea.sflag [#allocation4], %s871_s23 }
 0x795   : > { %p1096_p7 = pnand %p1787_p12, %p1532_p6 }
 0x797   : > { %p1097_p9 = pneg %p1096_p7 }
 0x799   : > { %1383 = dma.done.wait (%p1097_p9), %s872_s13, 128  }
 0x79a   : > { %1385 = vsyncadd (%p1097_p9), %s872_s13, 4294967168  ;;  %s882_s14 = scalar_lea.sflag [#allocation12], %s871_s23 }
 0x79b   : > { %1387 = dma.done.wait (%p1097_p9), %s882_s14, 512  }
 0x79c   : > { %1389 = vsyncadd (%p1097_p9), %s882_s14, 4294966784  ;;  %s1788_s24 = sld [smem:[#allocation20_spill]]  ;;  %s1791_s21 = smov %s1396_s22 }
 0x79d   : > { %s1789_s27 = sld [smem:[#allocation19_spill]] }
 0x79e   : > { %s1790_s23 = sld [smem:[#allocation21_spill]] }
 0x7a2   : > { %p27_p4 = scmp.ge.s32.totalorder %s1788_s24, 4  }
 0x7a3   : > { %s1792_s22 = smov %s1789_s27 }
 0x7a4   :  { %29 = sbr.rel (!%p27_p4) target bundleno = 13 (0xd), region = 126 }
 0x7a9   :  { %888 = vsyncpa [#allocation3], 1 }
 0x7aa   :  { %890 = vsyncpa [#allocation3 + $0x1], 1 }
 0x7ab   :  { %891 = vsyncpa [#allocation6], 1 }
 0x7ac   :  { %893 = vsyncpa [#allocation6 + $0x1], 1 }
 0x7ad   :  { %894 = vsyncpa [#allocation9], 1 }
 0x7ae   :  { %895 = vsyncpa [#allocation4], 1 }
 0x7af   :  { %897 = vsyncpa [#allocation4 + $0x1], 1 }
 0x7b0   :  { %898 = vsyncpa [#allocation12], 1 }
 0x7b1   :  { %900 = vsyncpa [#allocation12 + $0x1], 1 }

</bundles_post_ra>
